<compile_context>
chip_gen: v6e
topology: v6e:2x2x1
jax: 0.10.0
libtpu: 0.0.40
codegen_flags: <defaults>
</compile_context>

<pallas_src>
import functools

import jax
import jax.numpy as jnp
from jax.experimental import pallas as pl
from jax.experimental.pallas import tpu as pltpu


def gat_gate_kernel(x_ref, adj_ref, Wcat_ref, bcat_ref,
                    gWx_ref, gWh_ref, gb_ref, out_ref, *,
                    matmul_dtype, exp_dtype):
    mm = matmul_dtype
    approx = jnp.dtype(mm) != jnp.dtype(jnp.float32)   # exact recip in f32 mode

    Bt, N, D = x_ref.shape
    x = x_ref[...]                                     # (Bt, N, D)
    xf = x.astype(jnp.float32)

    # ---- h and h @ A_sym in ONE wide MXU matmul --------------------------
    # hh = x @ [W.T | W.T @ A_sym] + [bW | bW @ A_sym]   (f32 accumulation)
    x2 = x.reshape(Bt * N, D).astype(mm)               # N % 8 == 0 -> free reshape
    hh = jnp.dot(x2, Wcat_ref[...],
                 preferred_element_type=jnp.float32) + bcat_ref[...]
    # h / hA are only ever consumed as MXU operands: cast to mm exactly once.
    h_mm = hh[:, :D].astype(mm).reshape(Bt, N, D)
    hA_mm = hh[:, D:].astype(mm).reshape(Bt, N, D)

    # e + e.T == (h @ (A + A.T)) . h^T  -- A pre-symmetrized in the wrapper,
    # so the NxN transpose + add of the module is gone.
    e = jnp.einsum('bjd,bkd->bjk', hA_mm, h_mm,
                   preferred_element_type=jnp.float32)

    # ---- masked softmax over dim=1, then weight by adj --------------------
    adj_c = adj_ref[...]                               # compact dtype (bf16 here)
    mask = adj_c > 0                                   # no f32 adj materialization
    e_m = jnp.where(mask, e, jnp.float32(-9.0e15))
    m = jnp.max(e_m, axis=1, keepdims=True)
    t = e_m - m
    if jnp.dtype(exp_dtype) != jnp.dtype(jnp.float32):
        # v6e/v7x: EUP runs bf16 at ~2x rate; t <= 0 so exp <= 1, benign error.
        p = jnp.exp(t.astype(exp_dtype)).astype(jnp.float32)
    else:
        p = jnp.exp(t)
    s = jnp.sum(p, axis=1, keepdims=True)
    # Masked entries of p already underflowed to exactly 0; the adj multiply
    # both re-masks (fully-masked columns -> 0, matching the reference) and
    # applies any non-binary edge weights.  reciprocal goes to the EUP slot.
    att = (p * adj_c.astype(jnp.float32)) * pl.reciprocal(s, approx=approx)

    # h_prime = relu(att @ h)
    h_prime = jnp.maximum(
        jnp.einsum('bjk,bkd->bjd', att.astype(mm), h_mm,
                   preferred_element_type=jnp.float32), 0.0)

    # coeff = sigmoid(gate([x, h_prime])): VPU multiply + cross-lane reduce
    # instead of two (N,D)@(D,1) MXU matvecs; gate bias is an SMEM scalar.
    z = (jnp.sum(xf * gWx_ref[...] + h_prime * gWh_ref[...],
                 axis=-1, keepdims=True) + gb_ref[0, 0])
    coeff = jax.nn.sigmoid(z)

    out_ref[...] = (coeff * xf + (1.0 - coeff) * h_prime).astype(out_ref.dtype)


def _round_up(v, m):
    return (v + m - 1) // m * m


def _vmem_capacity_bytes():
    try:
        return int(pltpu.get_tpu_info().vmem_capacity_bytes)
    except Exception:
        return 64 * 1024 * 1024     # conservative: v7x has the smallest VMEM


def _bf16_vpu_ok():
    # bf16 VPU/EUP exists on v6e / v7x; not on v2..v5.  Default to False.
    try:
        kind = jax.devices()[0].device_kind.lower()
    except Exception:
        return False
    return not any(t in kind for t in ("v2", "v3", "v4", "v5"))


def _pick_block_b(B, N, D, budget_bytes):
    # Padded-layout VMEM estimate per graph, including bf16 operand copies and
    # the 2x double-buffered x/adj/out pipeline blocks from the BlockSpec.
    rN8, rN128, rD = _round_up(N, 8), _round_up(N, 128), _round_up(D, 128)
    nn = rN8 * rN128                       # one padded (N, N) plane (elements)
    nd = rN8 * rD                          # one padded (N, D) plane (elements)
    per_graph = 4 * (5 * nn + 8 * nd)      # live f32-equivalent intermediates
    per_graph += 2 * 2 * (nn + 2 * nd) * 4  # double-buffered in/out blocks
    bb = max(1, min(B, budget_bytes // max(per_graph, 1)))
    # Keep >= min(B, 4) grid steps: a 1-step grid disables DMA/compute overlap
    # and leaves the second v7x TensorCore idle.
    bb = min(bb, max(1, B // min(B, 4)))
    while B % bb:
        bb -= 1
    return bb


def gat_gate(x, adj, Wt, bW, A, gWx, gWh, gb, *,
             block_b=None, matmul_dtype=jnp.bfloat16, exp_dtype=None):
    B, N, D = x.shape
    assert adj.shape == (B, N, N)
    f32 = jnp.float32

    # Pad N to a multiple of 8 so the in-kernel (Bt,N,D)<->(Bt*N,D) reshape is
    # a free re-interpretation.  Padded nodes have no edges, so real-node
    # outputs are unaffected; padded rows are sliced off at the end.
    Np = _round_up(N, 8)
    if Np != N:
        x = jnp.pad(x, ((0, 0), (0, Np - N), (0, 0)))
        adj = jnp.pad(adj, ((0, 0), (0, Np - N), (0, Np - N)))

    # One-time parameter prep (outside the kernel hot path).
    A_sym = (A + A.T).astype(f32)                       # folds e + e.T into A
    Wt = Wt.astype(f32)
    bW = bW.reshape(1, D).astype(f32)
    W_cat = jnp.concatenate([Wt, Wt @ A_sym], axis=1).astype(matmul_dtype)  # (D, 2D)
    b_cat = jnp.concatenate([bW, bW @ A_sym], axis=1).astype(f32)           # (1, 2D)
    gWx = gWx.reshape(1, D).astype(f32)
    gWh = gWh.reshape(1, D).astype(f32)
    gb = gb.reshape(1, 1).astype(f32)

    if exp_dtype is None:
        exp_dtype = (jnp.bfloat16
                     if (jnp.dtype(matmul_dtype) == jnp.dtype(jnp.bfloat16)
                         and _bf16_vpu_ok())
                     else jnp.float32)

    vmem_cap = _vmem_capacity_bytes()
    if block_b is None:
        block_b = _pick_block_b(B, Np, D, budget_bytes=int(0.4 * vmem_cap))
    assert B % block_b == 0, "block_b must divide batch"

    kernel = functools.partial(gat_gate_kernel, matmul_dtype=matmul_dtype,
                               exp_dtype=exp_dtype)

    # TODO(synk): for production-size N, add a second grid axis over column
    # blocks of adj/e with an online (flash-style) softmax, and relayout the
    # output to a lane-dense multiple of 128 so stores are unmasked vst.
    out = pl.pallas_call(
        kernel,
        out_shape=jax.ShapeDtypeStruct((B, Np, D), x.dtype),
        grid=(B // block_b,),
        in_specs=[
            pl.BlockSpec((block_b, Np, D), lambda b: (b, 0, 0)),    # x
            pl.BlockSpec((block_b, Np, Np), lambda b: (b, 0, 0)),   # adj (compact)
            pl.BlockSpec((D, 2 * D), lambda b: (0, 0)),             # W_cat
            pl.BlockSpec((1, 2 * D), lambda b: (0, 0)),             # b_cat
            pl.BlockSpec((1, D), lambda b: (0, 0)),                 # gWx
            pl.BlockSpec((1, D), lambda b: (0, 0)),                 # gWh
            pl.BlockSpec(memory_space=pltpu.MemorySpace.SMEM),      # gb (scalar)
        ],
        out_specs=pl.BlockSpec((block_b, Np, D), lambda b: (b, 0, 0)),
        compiler_params=pltpu.CompilerParams(
            dimension_semantics=("parallel",),
            vmem_limit_bytes=min(int(0.9 * vmem_cap), 100 * 1024 * 1024)),
    )(x, adj, W_cat, b_cat, gWx, gWh, gb)

    if Np != N:
        out = out[:, :N, :]
    return out


def gat_gate_ref(x, adj, Wt, bW, A, gWx, gWh, gb):
    # Pure-JAX f32 reference mirroring the PyTorch forward exactly.
    bW = bW.reshape(1, -1)
    gb = gb.reshape(1, 1)
    h = jnp.einsum('bnd,de->bne', x, Wt) + bW                      # self.W(x)
    e = jnp.einsum('ijl,ikl->ijk', jnp.einsum('bnd,de->bne', h, A), h)
    e = e + jnp.transpose(e, (0, 2, 1))
    att = jnp.where(adj > 0, e, -9.0e15 * jnp.ones_like(e))
    att = jax.nn.softmax(att, axis=1)
    att = att * adj
    h_prime = jax.nn.relu(jnp.einsum('aij,ajk->aik', att, h))
    z = (jnp.einsum('bnd,do->bno', x, gWx.reshape(-1, 1))
         + jnp.einsum('bnd,do->bno', h_prime, gWh.reshape(-1, 1)) + gb)
    coeff = jax.nn.sigmoid(z)
    return coeff * x + (1.0 - coeff) * h_prime


if __name__ == "__main__":
    B, N, D = 2, 8, 32   # batch, nodes, features (n_in == n_out == D)

    key = jax.random.PRNGKey(0)
    kx, kadj, kw, kbw, ka, kg, kgb = jax.random.split(key, 7)

    x = jax.random.normal(kx, (B, N, D), dtype=jnp.float32)

    # symmetric 0/1 adjacency with self loops
    a = (jax.random.uniform(kadj, (B, N, N)) > 0.5).astype(jnp.float32)
    adj = jnp.clip(a + jnp.transpose(a, (0, 2, 1)) + jnp.eye(N)[None], 0.0, 1.0)
    adj_bf16 = adj.astype(jnp.bfloat16)   # compact adjacency stream (0/1 exact in bf16)

    # deterministic parameter init (shapes from GAT_gate.__init__)
    Wt = 0.1 * jax.random.normal(kw, (D, D), dtype=jnp.float32)     # W.weight.T
    bW = 0.1 * jax.random.normal(kbw, (1, D), dtype=jnp.float32)    # W.bias
    A = 0.1 * jax.random.normal(ka, (D, D), dtype=jnp.float32)      # self.A
    gW = 0.1 * jax.random.normal(kg, (2 * D, 1), dtype=jnp.float32) # gate.weight.T
    gWx, gWh = gW[:D], gW[D:]
    gb = 0.1 * jax.random.normal(kgb, (1, 1), dtype=jnp.float32)    # gate.bias

    ref = gat_gate_ref(x, adj, Wt, bW, A, gWx, gWh, gb)

    # Strict-precision check: f32 matmul operands, exact reciprocal, f32 exp.
    out_f32 = gat_gate(x, adj, Wt, bW, A, gWx, gWh, gb,
                       matmul_dtype=jnp.float32)
    out_f32 = jax.block_until_ready(out_f32)
    assert out_f32.shape == (B, N, D)
    assert jnp.allclose(out_f32, ref, rtol=1e-4, atol=1e-4)

    # Fast path: bf16 MXU operands (f32 accumulation), bf16 adj, approx recip,
    # bf16 exp when the chip supports it (v6e/v7x).
    out_bf16 = gat_gate(x, adj_bf16, Wt, bW, A, gWx, gWh, gb,
                        matmul_dtype=jnp.bfloat16)
    out_bf16 = jax.block_until_ready(out_bf16)
    assert out_bf16.shape == (B, N, D)
    assert jnp.allclose(out_bf16, ref, rtol=1.5e-1, atol=1.5e-1)

    print("KERNEL_OK")
</pallas_src>

<mosaic_0001>
module attributes {stable_mosaic.version = 11 : i64} {
  func.func @gat_gate_kernel(%arg0: i32, %arg1: memref<1x8x32xf32, #tpu.memory_space<vmem>>, %arg2: memref<1x8x8xf32, #tpu.memory_space<vmem>>, %arg3: memref<32x64xf32, #tpu.memory_space<vmem>>, %arg4: memref<1x64xf32, #tpu.memory_space<vmem>>, %arg5: memref<1x32xf32, #tpu.memory_space<vmem>>, %arg6: memref<1x32xf32, #tpu.memory_space<vmem>>, %arg7: memref<1x1xf32, #tpu.memory_space<smem>>, %arg8: memref<1x8x32xf32, #tpu.memory_space<vmem>>) attributes {dimension_semantics = [#tpu.dimension_semantics<parallel>], iteration_bounds = array<i64: 2>, scalar_prefetch = 0 : i64, scratch_operands = 0 : i64, tpu.core_type = #tpu.core_type<tc>, window_params = [{transform_indices = @transform_0, window_bounds = array<i64: 1, 8, 32>}, {transform_indices = @transform_1, window_bounds = array<i64: 1, 8, 8>}, {pipeline_mode = #tpu.pipeline_mode<synchronous>, transform_indices = @transform_2, window_bounds = array<i64: 32, 64>}, {pipeline_mode = #tpu.pipeline_mode<synchronous>, transform_indices = @transform_3, window_bounds = array<i64: 1, 64>}, {pipeline_mode = #tpu.pipeline_mode<synchronous>, transform_indices = @transform_4, window_bounds = array<i64: 1, 32>}, {pipeline_mode = #tpu.pipeline_mode<synchronous>, transform_indices = @transform_5, window_bounds = array<i64: 1, 32>}, {transform_indices = @transform_6, window_bounds = array<i64: 1, 1>}, {transform_indices = @transform_7, window_bounds = array<i64: 1, 8, 32>}]} {
    %c0 = arith.constant 0 : index
    %c0_0 = arith.constant 0 : index
    %c0_1 = arith.constant 0 : index
    %0 = vector.load %arg1[%c0, %c0_0, %c0_1] : memref<1x8x32xf32, #tpu.memory_space<vmem>>, vector<1x8x32xf32>
    %1 = vector.shape_cast %0 : vector<1x8x32xf32> to vector<8x32xf32>
    %c0_2 = arith.constant 0 : index
    %c0_3 = arith.constant 0 : index
    %2 = vector.load %arg3[%c0_2, %c0_3] : memref<32x64xf32, #tpu.memory_space<vmem>>, vector<32x64xf32>
    %cst = arith.constant dense<0.000000e+00> : vector<8x64xf32>
    %3 = tpu.matmul %1, %2, %cst {dimension_numbers = #tpu.dot_dimension_numbers<[1], [0], [0], [1], [0, 0, 1, 1], [], []>} : vector<8x32xf32>, vector<32x64xf32>, vector<8x64xf32> -> vector<8x64xf32>
    %c0_4 = arith.constant 0 : index
    %c0_5 = arith.constant 0 : index
    %4 = vector.load %arg4[%c0_4, %c0_5] : memref<1x64xf32, #tpu.memory_space<vmem>>, vector<1x64xf32>
    %5 = vector.broadcast %4 : vector<1x64xf32> to vector<8x64xf32>
    %6 = arith.addf %3, %5 : vector<8x64xf32>
    %7 = vector.extract_strided_slice %6 {offsets = [0, 0], sizes = [8, 32], strides = [1, 1]} : vector<8x64xf32> to vector<8x32xf32>
    %8 = vector.shape_cast %7 : vector<8x32xf32> to vector<1x8x32xf32>
    %9 = vector.extract_strided_slice %6 {offsets = [0, 32], sizes = [8, 32], strides = [1, 1]} : vector<8x64xf32> to vector<8x32xf32>
    %10 = vector.shape_cast %9 : vector<8x32xf32> to vector<1x8x32xf32>
    "tpu.trace_start"() <{level = 10 : i32, message = "bjd,bkd->bjk"}> : () -> ()
    %cst_6 = arith.constant dense<0.000000e+00> : vector<1x8x8xf32>
    %11 = tpu.matmul %10, %8, %cst_6 {dimension_numbers = #tpu.dot_dimension_numbers<[2], [2], [1], [1], [0, 0, 0, 1, 1, 1], [0], [0]>} : vector<1x8x32xf32>, vector<1x8x32xf32>, vector<1x8x8xf32> -> vector<1x8x8xf32>
    "tpu.trace_stop"() : () -> ()
    %c0_7 = arith.constant 0 : index
    %c0_8 = arith.constant 0 : index
    %c0_9 = arith.constant 0 : index
    %12 = vector.load %arg2[%c0_7, %c0_8, %c0_9] : memref<1x8x8xf32, #tpu.memory_space<vmem>>, vector<1x8x8xf32>
    %cst_10 = arith.constant 0.000000e+00 : f32
    %13 = vector.broadcast %cst_10 : f32 to vector<1x8x8xf32>
    %14 = arith.cmpf ogt, %12, %13 : vector<1x8x8xf32>
    %cst_11 = arith.constant -9.000000e+15 : f32
    %15 = vector.broadcast %cst_11 : f32 to vector<1x8x8xf32>
    %16 = arith.select %14, %11, %15 : vector<1x8x8xi1>, vector<1x8x8xf32>
    %cst_12 = arith.constant dense<0xFF800000> : vector<1x8xf32>
    %17 = vector.multi_reduction <maximumf>, %16, %cst_12 [1] : vector<1x8x8xf32> to vector<1x8xf32>
    %18 = vector.shape_cast %17 : vector<1x8xf32> to vector<1x1x8xf32>
    %19 = vector.broadcast %18 : vector<1x1x8xf32> to vector<1x8x8xf32>
    %20 = arith.subf %16, %19 : vector<1x8x8xf32>
    %21 = math.exp %20 : vector<1x8x8xf32>
    %cst_13 = arith.constant dense<0.000000e+00> : vector<1x8xf32>
    %22 = vector.multi_reduction <add>, %21, %cst_13 [1] : vector<1x8x8xf32> to vector<1x8xf32>
    %23 = vector.shape_cast %22 : vector<1x8xf32> to vector<1x1x8xf32>
    %24 = arith.mulf %21, %12 : vector<1x8x8xf32>
    %25 = tpu.reciprocal %23 : vector<1x1x8xf32> -> vector<1x1x8xf32>
    %26 = vector.broadcast %25 : vector<1x1x8xf32> to vector<1x8x8xf32>
    %27 = arith.mulf %24, %26 : vector<1x8x8xf32>
    "tpu.trace_start"() <{level = 10 : i32, message = "bjk,bkd->bjd"}> : () -> ()
    %cst_14 = arith.constant dense<0.000000e+00> : vector<1x8x32xf32>
    %28 = tpu.matmul %27, %8, %cst_14 {dimension_numbers = #tpu.dot_dimension_numbers<[2], [1], [1], [2], [0, 0, 0, 1, 1, 2], [0], [0]>} : vector<1x8x8xf32>, vector<1x8x32xf32>, vector<1x8x32xf32> -> vector<1x8x32xf32>
    "tpu.trace_stop"() : () -> ()
    %cst_15 = arith.constant 0.000000e+00 : f32
    %29 = vector.broadcast %cst_15 : f32 to vector<1x8x32xf32>
    %30 = arith.maximumf %28, %29 : vector<1x8x32xf32>
    %c0_16 = arith.constant 0 : index
    %c0_17 = arith.constant 0 : index
    %31 = vector.load %arg5[%c0_16, %c0_17] : memref<1x32xf32, #tpu.memory_space<vmem>>, vector<1x32xf32>
    %32 = vector.shape_cast %31 : vector<1x32xf32> to vector<1x1x32xf32>
    %33 = vector.broadcast %32 : vector<1x1x32xf32> to vector<1x8x32xf32>
    %34 = arith.mulf %0, %33 : vector<1x8x32xf32>
    %c0_18 = arith.constant 0 : index
    %c0_19 = arith.constant 0 : index
    %35 = vector.load %arg6[%c0_18, %c0_19] : memref<1x32xf32, #tpu.memory_space<vmem>>, vector<1x32xf32>
    %36 = vector.shape_cast %35 : vector<1x32xf32> to vector<1x1x32xf32>
    %37 = vector.broadcast %36 : vector<1x1x32xf32> to vector<1x8x32xf32>
    %38 = arith.mulf %30, %37 : vector<1x8x32xf32>
    %39 = arith.addf %34, %38 : vector<1x8x32xf32>
    %cst_20 = arith.constant dense<0.000000e+00> : vector<1x8xf32>
    %40 = vector.multi_reduction <add>, %39, %cst_20 [2] : vector<1x8x32xf32> to vector<1x8xf32>
    %41 = vector.shape_cast %40 : vector<1x8xf32> to vector<1x8x1xf32>
    %c0_21 = arith.constant 0 : index
    %c0_22 = arith.constant 0 : index
    %42 = memref.load %arg7[%c0_21, %c0_22] : memref<1x1xf32, #tpu.memory_space<smem>>
    %43 = vector.broadcast %42 : f32 to vector<1x8x1xf32>
    %44 = arith.addf %41, %43 : vector<1x8x1xf32>
    %45 = arith.negf %44 : vector<1x8x1xf32>
    %46 = math.exp %45 : vector<1x8x1xf32>
    %cst_23 = arith.constant 1.000000e+00 : f32
    %47 = vector.broadcast %cst_23 : f32 to vector<1x8x1xf32>
    %48 = arith.addf %47, %46 : vector<1x8x1xf32>
    %49 = arith.divf %47, %48 : vector<1x8x1xf32>
    %50 = vector.broadcast %49 : vector<1x8x1xf32> to vector<1x8x32xf32>
    %51 = arith.mulf %50, %0 : vector<1x8x32xf32>
    %cst_24 = arith.constant 1.000000e+00 : f32
    %52 = vector.broadcast %cst_24 : f32 to vector<1x8x1xf32>
    %53 = arith.subf %52, %49 : vector<1x8x1xf32>
    %54 = vector.broadcast %53 : vector<1x8x1xf32> to vector<1x8x32xf32>
    %55 = arith.mulf %54, %30 : vector<1x8x32xf32>
    %56 = arith.addf %51, %55 : vector<1x8x32xf32>
    %c0_25 = arith.constant 0 : index
    %c0_26 = arith.constant 0 : index
    %c0_27 = arith.constant 0 : index
    %57 = vector.load %arg8[%c0_25, %c0_26, %c0_27] : memref<1x8x32xf32, #tpu.memory_space<vmem>>, vector<1x8x32xf32>
    tpu.vector_store %arg8[%c0_25, %c0_26, %c0_27], %56 {strides = array<i32>} : memref<1x8x32xf32, #tpu.memory_space<vmem>>, vector<1x8x32xf32>,
    return
  }
  func.func @transform_0(%arg0: i32) -> (i32, i32, i32) {
    %c0_i32 = arith.constant 0 : i32
    %c0_i32_0 = arith.constant 0 : i32
    %c0_i32_1 = arith.constant 0 : i32
    return %arg0, %c0_i32, %c0_i32_0 : i32, i32, i32
  }
  func.func @transform_1(%arg0: i32) -> (i32, i32, i32) {
    %c0_i32 = arith.constant 0 : i32
    %c0_i32_0 = arith.constant 0 : i32
    %c0_i32_1 = arith.constant 0 : i32
    return %arg0, %c0_i32, %c0_i32_0 : i32, i32, i32
  }
  func.func @transform_2(%arg0: i32) -> (i32, i32) {
    %c0_i32 = arith.constant 0 : i32
    %c0_i32_0 = arith.constant 0 : i32
    %c0_i32_1 = arith.constant 0 : i32
    return %c0_i32, %c0_i32_0 : i32, i32
  }
  func.func @transform_3(%arg0: i32) -> (i32, i32) {
    %c0_i32 = arith.constant 0 : i32
    %c0_i32_0 = arith.constant 0 : i32
    %c0_i32_1 = arith.constant 0 : i32
    return %c0_i32, %c0_i32_0 : i32, i32
  }
  func.func @transform_4(%arg0: i32) -> (i32, i32) {
    %c0_i32 = arith.constant 0 : i32
    %c0_i32_0 = arith.constant 0 : i32
    %c0_i32_1 = arith.constant 0 : i32
    return %c0_i32, %c0_i32_0 : i32, i32
  }
  func.func @transform_5(%arg0: i32) -> (i32, i32) {
    %c0_i32 = arith.constant 0 : i32
    %c0_i32_0 = arith.constant 0 : i32
    %c0_i32_1 = arith.constant 0 : i32
    return %c0_i32, %c0_i32_0 : i32, i32
  }
  func.func @transform_6(%arg0: i32) -> (i32, i32) {
    %c0_i32 = arith.constant 0 : i32
    %c0_i32_0 = arith.constant 0 : i32
    %c0_i32_1 = arith.constant 0 : i32
    return %c0_i32, %c0_i32_0 : i32, i32
  }
  func.func @transform_7(%arg0: i32) -> (i32, i32, i32) {
    %c0_i32 = arith.constant 0 : i32
    %c0_i32_0 = arith.constant 0 : i32
    %c0_i32_1 = arith.constant 0 : i32
    return %arg0, %c0_i32, %c0_i32_0 : i32, i32, i32
  }
}

</mosaic_0001>

<bundles_post_ra>
// kernel: tpu_custom_call.1
= control target key start
LH: loop header
LB: loop body
LE: loop exit
PB: predicated region body
PF: predicated region fallthrough
CT: control target
= control target key end

     0   :  { %s1320_s0 = inlined_call_operand.hbm [shape: f32[2,8,32], index: 0, kind: input, shape index: {}]   ;;  %s1321_s1 = inlined_call_operand.hbm [shape: f32[2,8,8], index: 1, kind: input, shape index: {}]   ;;  %s1322_s2 = inlined_call_operand.hbm [shape: f32[32,64], index: 2, kind: input, shape index: {}]   ;;  %s1323_s3 = inlined_call_operand.vmem [shape: f32[1,64], index: 3, kind: input, shape index: {}]   ;;  %s1324_s4 = inlined_call_operand.vmem [shape: f32[1,32], index: 4, kind: input, shape index: {}]   ;;  %s1325_s5 = inlined_call_operand.vmem [shape: f32[1,32], index: 5, kind: input, shape index: {}]   ;;  %s1326_s6 = inlined_call_operand.<no memory space> [shape: f32[1,1], index: 6, kind: input, shape index: {}]   ;;  %s1327_s7 = inlined_call_operand.hbm [shape: f32[2,8,32], index: 7, kind: output, shape index: {}]  }
   0x1   :  { %1333 = sst [smem:[#allocation16_spill]] %s1322_s2 }
   0x2   :  { %12 = sst [smem:[#allocation2]] %s1326_s6 }
   0x3   :  { %13 = vsyncpa [#allocation4], 0 }
   0x4   :  { %15 = vsyncpa [#allocation4 + $0x1], 0 }
   0x5   :  { %16 = vsyncpa [#allocation7], 0 }
   0x6   :  { %18 = vsyncpa [#allocation7 + $0x1], 0 }
   0x7   :  { %19 = vsyncpa [#allocation5], 0 }
   0x8   :  { %21 = vsyncpa [#allocation5 + $0x1], 0  ;;  %s1095_s26 = smov 0   ;;  %s1097_s27 = smov 0  }
   0x9   :  { %s1099_s28 = smov 0   ;;  %s1101_s29 = smov 0  }
   0xa LB: > { %1334 = sst [smem:[#allocation14_spill]] %s1037_s28  ;;  %s1116_s6 = sadd.s32 4294967295, %s1041_s29   ;;  %s1041_s29 = sphi %s1101_s29, %s1355_s29   ;;  %s1037_s28 = sphi %s1099_s28, %s1352_s28   ;;  %s1033_s27 = sphi %s1097_s27, %s1354_s27   ;;  %s1029_s26 = sphi %s1095_s26, %s1353_s26  }
   0xb   : > { %s757_s30 = sadd.s32 4294967294, %s1041_s29   ;;  %p47_p0 = scmp.ne.s32.totalorder %s1033_s27, %s1029_s26 }
   0xc   : > { %p1329_p1 = scmp.eq.s32.totalorder %s1116_s6, 0  ;;  %p208_p3 = scmp.eq.s32.totalorder %s757_s30, 1 }
   0xd   : > { %p758_p5 = scmp.ge.s32.totalorder %s1041_s29, 1  ;;  %p215_p7 = scmp.lt.s32.totalorder %s1041_s29, 3 }
   0xe   : > { %p1125_p4 = por %p1329_p1, %p47_p0  ;;  %p1130_p6 = por %p208_p3, %p47_p0 }
   0xf   : > { %p1135_p8 = pnand %p758_p5, %p215_p7  ;;  %s1043_s11 = smov [#allocation8]  }
  0x10   : > { %s1335_s8 = scalar_select %p1125_p4, 1, 0 }
  0x11   : > { %s1336_s9 = scalar_select %p1130_p6, 1, 0 }
  0x12   : > { %s1337_s10 = scalar_select %p1135_p8, 1, 0 }
  0x13   : > { %s227_s12 = sshll.u32 %s1043_s11, 4  ;;  %p822_p9 = pneg %p1135_p8  ;;  %s228_s12 = int_to_ptr.vmem [resolvable:$true] %s227_s12 }
  0x14   : > { %s1149_s14 = sadd.s32 1, %s1041_s29   ;;  %s34_s15 = sadd.s32 1, %s1037_s28 }
  0x15   : > { %p1144_p11 = pnand %p822_p9, %p1329_p1  ;;  %s31_s16 = ssub.s32 %s1041_s29, %s1149_s14 }
  0x16   : > { %s898_s17 = scalar_lea.vmem %s228_s12, 512  ;;  %p906_p5 = scmp.lt.s32.totalorder %s228_s12, %s228_s12 }
  0x17   : > { %p889_p12 = pneg %p1144_p11  ;;  %p899_p13 = scmp.ne.s32.totalorder %s228_s12, %s898_s17 }
  0x18   : > { %p907_p7 = scmp.lt.s32.totalorder %s898_s17, %s898_s17 }
  0x19   : > { %p901_p0 = pnand %p899_p13, %p889_p12 }
  0x1a   : > { %p908_p10 = por %p907_p7, %p906_p5 }
  0x1b   : > { %p902_p3 = pneg %p901_p0 }
  0x1d   : > { %p909_p2 = pnand %p908_p10, %p902_p3 }
  0x1f   : > { %912 = shalt.err (!%p909_p2)
}
  0x20   : > { %s1044_s18 = smov 128   ;;  %s1045_s19 = smov 8  }
  0x21   : > { %s1339_s2 = sld [smem:[#allocation16_spill]]  ;;  %p32_p9 = scmp.eq.s32.totalorder %s31_s16, 0 }
  0x22   : > { %p41_p12 = scmp.ne.s32.totalorder %s1037_s28, %s1033_s27  ;;  %p42_p10 = scmp.eq.s32.totalorder %s1041_s29, 0 }
  0x23   : > { %p838_p2 = scmp.lt.s32.totalorder %s1041_s29, 2  ;;  %p1341_p0 = scmp.eq.s32.totalorder %s1116_s6, 1 }
  0x24   : > { %s1166_s22 = scalar_select %p32_p9, %s1037_s28, %s34_s15  }
  0x25   : > { %p43_p13 = por %p42_p10, %p41_p12  ;;  %p1170_p3 = por %p1341_p0, %p41_p12 }
  0x26   : > { %1340 = sst [smem:[#allocation15_spill]] %s1166_s22  ;;  %s253_s24 = sand.u32 1, %s1037_s28  }
  0x27   : > { %825 = dma.hbm_to_vmem [thread:$0]  (!%p1144_p11), %s1339_s2, 512, %s228_s12, [#allocation7], %s1044_s18, %s1044_s18, %s1045_s19  }
  0x28   : > { %s1342_s23 = scalar_select %p1170_p3, 1, 0 }
  0x29   : > { %s762_s25 = sshll.u32 %s1041_s29, 7  ;;  %s1176_s30 = sshll.u32 %s253_s24, 3 }
  0x2a   : > { %s1181_s12 = scalar_lea.hbm %s1320_s0, %s762_s25  ;;  %s257_s15 = scalar_lea.vmem [#allocation3], %s1176_s30 }
  0x2b   : > { %s264_s16 = sshll.u32 %s257_s15, 4  ;;  %p1184_p11 = pnand %p838_p2, %p43_p13  ;;  %s265_s16 = int_to_ptr.vmem [resolvable:$true] %s264_s16 }
  0x2c   : > { %s1191_s20 = scalar_lea.hbm %s1321_s1, %s762_s25  ;;  %s254_s21 = scalar_lea.sflag [#allocation4], %s253_s24 }
  0x2d   : > { %s913_s11 = scalar_lea.hbm %s1181_s12, 128  ;;  %p915_p7 = pneg %p1184_p11 }
  0x2e   : > { %p914_p5 = scmp.ne.s32.totalorder %s1181_s12, %s913_s11  ;;  %s918_s2 = scalar_lea.hbm %s1320_s0, 256 }
  0x2f   : > { %p919_p10 = scmp.lt.s32.totalorder %s1181_s12, %s1320_s0  ;;  %p920_p2 = scmp.lt.s32.totalorder %s918_s2, %s913_s11 }
  0x30   : > { %p916_p9 = pnand %p915_p7, %p914_p5 }
  0x31   : > { %p921_p13 = por %p920_p2, %p919_p10 }
  0x32   : > { %p917_p12 = pneg %p916_p9 }
  0x34   : > { %p922_p0 = pnand %p921_p13, %p917_p12 }
  0x36   : > { %925 = shalt.err (!%p922_p0)
}
  0x37   : > { %s926_s24 = scalar_lea.vmem %s265_s16, 128  ;;  %s1046_s25 = smov [#allocation3]  }
  0x38   : > { %p927_p1 = scmp.ne.s32.totalorder %s265_s16, %s926_s24  ;;  %s931_s18 = sshll.u32 %s1046_s25, 4  ;;  %s932_s18 = int_to_ptr.vmem [resolvable:$false] %s931_s18 }
  0x39   : > { %s933_s19 = scalar_lea.vmem %s932_s18, 256  ;;  %p934_p9 = scmp.lt.s32.totalorder %s265_s16, %s932_s18 }
  0x3a   : > { %p929_p6 = pnand %p927_p1, %p915_p7  ;;  %p935_p3 = scmp.lt.s32.totalorder %s933_s19, %s926_s24 }
  0x3c   : > { %p930_p5 = pneg %p929_p6  ;;  %p936_p4 = por %p935_p3, %p934_p9 }
  0x3e   : > { %p937_p8 = pnand %p936_p4, %p930_p5 }
  0x40   : > { %940 = shalt.err (!%p937_p8)
}
  0x41   : > { %829 = dma.hbm_to_vmem [thread:$0]  (!%p1184_p11), %s1181_s12, 128, %s265_s16, %s254_s21  }
  0x42   : > { %s271_s2 = sand.u32 1, %s1041_s29   ;;  %s275_s28 = scalar_lea.vmem [#allocation6], %s1176_s30 }
  0x43   : > { %s282_s22 = sshll.u32 %s275_s28, 4  ;;  %s272_s11 = scalar_lea.sflag [#allocation7], %s271_s2  ;;  %s283_s22 = int_to_ptr.vmem [resolvable:$true] %s282_s22 }
  0x44   : > { %s941_s13 = scalar_lea.hbm %s1191_s20, 128  ;;  %s946_s25 = scalar_lea.hbm %s1321_s1, 256 }
  0x45   : > { %p942_p1 = scmp.ne.s32.totalorder %s1191_s20, %s941_s13  ;;  %p947_p8 = scmp.lt.s32.totalorder %s1191_s20, %s1321_s1 }
  0x46   : > { %p948_p3 = scmp.lt.s32.totalorder %s946_s25, %s941_s13 }
  0x47   : > { %p944_p4 = pnand %p942_p1, %p915_p7 }
  0x48   : > { %p949_p12 = por %p948_p3, %p947_p8 }
  0x49   : > { %p945_p6 = pneg %p944_p4 }
  0x4b   : > { %p950_p10 = pnand %p949_p12, %p945_p6 }
  0x4d   : > { %953 = shalt.err (!%p950_p10)
}
  0x4e   : > { %s954_s30 = scalar_lea.vmem %s283_s22, 128  ;;  %s1047_s12 = smov [#allocation6]  }
  0x4f   : > { %p955_p2 = scmp.ne.s32.totalorder %s283_s22, %s954_s30  ;;  %s959_s16 = sshll.u32 %s1047_s12, 4  ;;  %s960_s16 = int_to_ptr.vmem [resolvable:$false] %s959_s16 }
  0x50   : > { %s961_s21 = scalar_lea.vmem %s960_s16, 256  ;;  %p962_p5 = scmp.lt.s32.totalorder %s283_s22, %s960_s16 }
  0x51   : > { %p957_p13 = pnand %p955_p2, %p915_p7  ;;  %p963_p9 = scmp.lt.s32.totalorder %s961_s21, %s954_s30 }
  0x53   : > { %p958_p0 = pneg %p957_p13  ;;  %p964_p1 = por %p963_p9, %p962_p5 }
  0x55   : > { %p965_p4 = pnand %p964_p1, %p958_p0 }
  0x57   : > { %968 = shalt.err (!%p965_p4)
}
  0x58   : > { %832 = dma.hbm_to_vmem [thread:$0]  (!%p1184_p11), %s1191_s20, 128, %s283_s22, %s272_s11  }
  0x59   : > { %p1344_p6 = scmp.ne.s32.totalorder %s1337_s10, 0 }
  0x5a   : > { %s1236_s2 = sand.u32 (!%p1344_p6), 1, %s1033_s27   ;;  %p1345_p7 = scmp.ne.s32.totalorder (!%p1344_p6), %s1335_s8, 0 }
  0x5b   : > { %291 = sbr.rel (%p1344_p6) target bundleno = 1068 (0x42c), region = 48  ;;  %s1239_s28 = sshll.u32 (!%p1344_p6), %s1236_s2, 3 }
  0x5c   : > { %s294_s13 = scalar_lea.sflag (!%p1344_p6), [#allocation4], %s1236_s2  ;;  %s297_s15 = scalar_lea.vmem (!%p1344_p6), [#allocation3], %s1239_s28 }
  0x60   : > { %1012 = dma.done.wait (%p1345_p7), %s294_s13, 128  }
  0x61   : > { %1014 = vsyncadd (%p1345_p7), %s294_s13, 4294967168  ;;  %s302_s10 = sand.u32 1, %s1116_s6   ;;  %s306_s20 = scalar_lea.vmem [#allocation6], %s1239_s28 }
  0x62   : > { %s303_s17 = scalar_lea.sflag [#allocation7], %s302_s10 }
  0x63   : > { %1016 = dma.done.wait (%p1345_p7), %s303_s17, 128  }
  0x64   : > { %1018 = vsyncadd (%p1345_p7), %s303_s17, 4294967168  ;;  %p1346_p11 = scmp.eq.s32.totalorder %s1116_s6, 0 }
  0x66   : > { %1020 = dma.done.wait (%p1346_p11), [#allocation7], 512   ;;  %p1347_p8 = pmov %p1346_p11 }
  0x67   : > { %v1048_v0 = vmov 0.0   ;;  %vm1049_vm0 = vmmov 0   ;;  %v350_v1 = vld [vmem:[#allocation8 + $0x18] sm:$0xff]  ;;  %v349_v2 = vld [vmem:[#allocation8 + $0x10] sm:$0xff]  ;;  %v348_v3 = vld [vmem:[#allocation8 + $0x8] sm:$0xff]  ;;  %vm358_vm1 = vcmask 261120  }
  0x68   : > { %1022 = vsyncadd (%p1347_p8), [#allocation7], 4294966784  ;;  %791 = vmatprep.subr.mxu0 %v1048_v0  ;;  %799 = vmatprep.mubr.msk.f32.mxu0 %vm1049_vm0, %v1048_v0  ;;  %v347_v4 = vld [vmem:[#allocation8] sm:$0xff]  ;;  %s1050_s11 = smov 96   ;;  %v509_v11 = vld [vmem:[%s306_s20] sm:$0xff]  ;;  %vm512_vm3 = vcmask 64512  }
  0x69   : > { %802 = vmatprep.subr.mxu1 %v1048_v0  ;;  %804 = vmatprep.mubr.msk.f32.mxu1 %vm1049_vm0, %v1048_v0  ;;  %v1259_v5 = vld [vmem:[%s297_s15] sm:$0xff]  ;;  %vm510_vm2 = vcmp.gt.f32.partialorder %v509_v11, 0.0  ;;  %s627_s30 = sld [smem:[#allocation2]]  ;;  %s779_s12 = sshll.u32 %s1116_s6, 7 }
  0x6a   : > { %792 = vmatpush3.msra.mxu0 %v350_v1  ;;  %v770_v6 = vld [vmem:[%s1323_s3] ss:$0 sm:$0xff]  ;;  %s345_s16 = scalar_lea.vmem [#allocation9], %s1239_s28  ;;  %s653_s10 = scalar_lea.hbm %s1327_s7, %s779_s12 }
  0x6b   : > { %793 = vmatprep.subr.mxu0 %v1048_v0  ;;  %v775_v35 = vld [vmem:[%s1324_s4] ss:$0 sm:$0xff]  ;;  %s655_s21 = sshll.u32 %s345_s16, 4  ;;  %s642_s17 = scalar_lea.sflag [#allocation5], %s1236_s2  ;;  %s656_s21 = int_to_ptr.vmem [resolvable:$true] %s655_s21 }
  0x6c   : > { %794 = vmatpush3.msra.mxu0 %v349_v2  ;;  %v776_v37 = vld [vmem:[%s1325_s5] ss:$0 sm:$0xff]  ;;  %v614_v39 = vmul.f32 %v775_v35, %v1259_v5  ;;  %s969_s20 = scalar_lea.vmem %s656_s21, 128  ;;  %p1348_p12 = scmp.ne.s32.totalorder %s1342_s23, 0 }
  0x6d   : > { %795 = vmatprep.subr.mxu0 %v1048_v0  ;;  %p970_p3 = scmp.ne.s32.totalorder %s656_s21, %s969_s20  ;;  %s1051_s6 = smov [#allocation9]  }
  0x6e   : > { %796 = vmatpush3.msra.mxu0 %v348_v3  ;;  %s973_s28 = sshll.u32 %s1051_s6, 4  ;;  %s974_s28 = int_to_ptr.vmem [resolvable:$false] %s973_s28 }
  0x6f   : > { %797 = vmatprep.subr.mxu0 %v1048_v0  ;;  %v628_v44 = vstv %s627_s30  ;;  %p971_p10 = pnand %p970_p3, %p1348_p12  ;;  %s975_s8 = scalar_lea.vmem %s974_s28, 256 }
  0x70   : > { %798 = vmatpush3.msra.mxu0 %v347_v4  ;;  %p976_p13 = scmp.lt.s32.totalorder %s656_s21, %s974_s28  ;;  %p977_p0 = scmp.lt.s32.totalorder %s975_s8, %s969_s20 }
  0x71   : > { %800 = vmatmul.mubr.msk.f32.vlgmr.msra.gmra.mxu0 %vm358_vm1, %v1259_v5  ;;  %p972_p2 = pneg %p971_p10 }
  0x72   : > { %p978_p5 = por %p977_p0, %p976_p13 }
  0x74   : > { %p979_p9 = pnand %p978_p5, %p972_p2 }
 0x131   : > { %v428_v7 = vpop.f32.mrf.mxu0 }
 0x132   : > { %v429_v8 = vadd.f32 %v770_v6, %v428_v7 }
 0x133   : > { %v801_v9 = vpop.f32.mrf.mxu0 }
 0x134   : > { %433 = vrot.lane.b32.xlu0 %v429_v8, %s1050_s11  ;;  %803 = vmatpush3.xpose.msk.msra.mxu1 %vm358_vm1, %v429_v8 }
 0x135   : > { %807 = vmatprep.subr.mxu1 %v1048_v0 }
 0x1a6   : > { %v434_v10 = vpop.permute.xlu0 %433 }
 0x1a7   : > { %805 = vmatmul.mubr.msk.f32.vlgmr.msra.gmra.mxu1 %vm358_vm1, %v434_v10 }
 0x1a8   : > { %808 = vmatpush3.msra.mxu1 %v429_v8  ;;  %809 = vmatprep.mubr.msk.f32.mxu1 %vm1049_vm0, %v1048_v0 }
 0x267   : > { %v505_v12 = vpop.f32.mrf.mxu1 }
 0x268   : > { %v511_v13 = vsel %vm510_vm2, %v505_v12, -9e+15 }
 0x269   : > { %v513_v14 = vsel %vm512_vm3, %v511_v13, -inf  ;;  %v806_v15 = vpop.f32.mrf.mxu1 }
 0x26a   : > { %v514_v16 = vrot.slane %v513_v14, 4 }
 0x26c   : > { %v515_v17 = vmax.f32 %v513_v14, %v514_v16 }
 0x26e   : > { %v516_v18 = vrot.slane %v515_v17, 2 }
 0x270   : > { %v517_v19 = vmax.f32 %v515_v17, %v516_v18 }
 0x272   : > { %v518_v20 = vrot.slane %v517_v19, 1 }
 0x274   : > { %v519_v21 = vmax.f32 %v517_v19, %v518_v20 }
 0x276   : > { %v520_v22 = vsub.f32 %v511_v13, %v519_v21 }
 0x278   : > { %v521_v23 = vmul.f32 1.442695, %v520_v22 }
 0x27a   : > { %879 = vpow2.f32 %v521_v23 }
 0x287   : > { %v880_v24 = vpop.eup %879 }
 0x288   : > { %v523_v25 = vsel %vm512_vm3, %v880_v24, 0.0  ;;  %v530_v32 = vmul.f32 %v880_v24, %v509_v11 }
 0x289   : > { %v524_v26 = vrot.slane %v523_v25, 4 }
 0x28b   : > { %v525_v27 = vadd.f32 %v524_v26, %v523_v25 }
 0x28d   : > { %v526_v28 = vrot.slane %v525_v27, 2 }
 0x28f   : > { %v527_v29 = vadd.f32 %v526_v28, %v525_v27 }
 0x291   : > { %v528_v30 = vrot.slane %v527_v29, 1 }
 0x293   : > { %v529_v31 = vadd.f32 %v528_v30, %v527_v29 }
 0x295   : > { %881 = vrcp.f32 %v529_v31 }
 0x2a2   : > { %v882_v33 = vpop.eup %881 }
 0x2a3   : > { %v532_v34 = vmul.f32 %v882_v33, %v530_v32 }
 0x2a5   : > { %810 = vmatmul.mubr.msk.f32.vlgmr.msra.gmra.mxu1 %vm512_vm3, %v532_v34 }
 0x365   : > { %v602_v36 = vpop.f32.mrf.mxu1 }
 0x366   : > { %v606_v38 = vmax.f32 %v602_v36, 0.0 }
 0x367   : > { %v811_v40 = vpop.f32.mrf.mxu1 }
 0x368   : > { %v622_v41 = vmul.f32 %v776_v37, %v606_v38 }
 0x36a   : > { %v623_v42 = vadd.f32 %v622_v41, %v614_v39 }
 0x36c   : > { %v624_v43 = vsel %vm358_vm1, %v623_v42, 0.0 }
 0x36d   : > { %625 = vadd.xlane.f32.xlu0 %v624_v43 }
 0x3f6   : > { %v626_v45 = vpop.xlane.xlu0 %625 }
 0x3f7   : > { %v629_v46 = vadd.f32 %v628_v44, %v626_v45 }
 0x3f9   : > { %v777_v47 = vmul.f32 -1.442695, %v629_v46 }
 0x3fb   : > { %883 = vpow2.f32 %v777_v47 }
 0x408   : > { %v884_v48 = vpop.eup %883 }
 0x409   : > { %v633_v49 = vadd.f32 1.0, %v884_v48 }
 0x40b   : > { %885 = vrcp.f32 %v633_v49 }
 0x418   : > { %v886_v50 = vpop.eup %885 }
 0x419   : > { %v637_v51 = vsub.f32 1.0, %v886_v50  ;;  %v636_v52 = vmul.f32 %v886_v50, %v1259_v5 }
 0x41b   : > { %v638_v53 = vmul.f32 %v637_v51, %v606_v38 }
 0x41d   : > { %v639_v54 = vadd.f32 %v638_v53, %v636_v52 }
 0x41f   : > { %640 = vst.msk [vmem:[%s345_s16] sm:$0xff] %vm358_vm1, %v639_v54 }
 0x420   : > { %982 = shalt.err (!%p979_p9)
}
 0x421   : > { %s983_s22 = scalar_lea.hbm %s653_s10, 128  ;;  %s987_s24 = scalar_lea.hbm %s1327_s7, 256 }
 0x422   : > { %p984_p1 = scmp.ne.s32.totalorder %s653_s10, %s983_s22  ;;  %p988_p7 = scmp.lt.s32.totalorder %s653_s10, %s1327_s7 }
 0x423   : > { %p989_p11 = scmp.lt.s32.totalorder %s987_s24, %s983_s22 }
 0x424   : > { %p985_p4 = pnand %p984_p1, %p1348_p12 }
 0x425   : > { %p990_p8 = por %p989_p11, %p988_p7 }
 0x426   : > { %p986_p6 = pneg %p985_p4 }
 0x428   : > { %p991_p3 = pnand %p990_p8, %p986_p6 }
 0x42a   : > { %994 = shalt.err (!%p991_p3)
}
 0x42b   : > { %820 = dma.vmem_to_hbm [thread:$0]  (%p1348_p12), %s656_s21, 128, %s653_s10, %s642_s17  }
 0x42c PF: > { %s667_s19 = sand.u32 1, %s1029_s26   ;;  %p1349_p10 = scmp.ne.s32.totalorder %s1336_s9, 0 }
 0x42d   : > { %p1350_p2 = scmp.ge.s32.totalorder %s1041_s29, 2  ;;  %s668_s30 = scalar_lea.sflag [#allocation5], %s667_s19 }
 0x42f   : > { %p834_p13 = pnand %p1350_p2, %p1349_p10 }
 0x431   : > { %p835_p0 = pneg %p834_p13 }
 0x433   : > { %1024 = dma.done.wait (%p835_p0), %s668_s30, 128  }
 0x434   : > { %1026 = vsyncadd (%p835_p0), %s668_s30, 4294967168  ;;  %s1351_s12 = sld [smem:[#allocation14_spill]]  ;;  %p24_p5 = scmp.ge.s32.totalorder %s1149_s14, 4  }
 0x435   : > { %s1352_s28 = sld [smem:[#allocation15_spill]]  ;;  %s1353_s26 = smov %s1033_s27 }
 0x436   : > { %s1355_s29 = smov %s1149_s14  ;;  %26 = sbr.rel (!%p24_p5) target bundleno = 10 (0xa), region = 110 }
 0x43a   : > { %s1354_s27 = smov %s1351_s12 }
 0x43b   :  { %673 = vsyncpa [#allocation4], 1 }
 0x43c   :  { %675 = vsyncpa [#allocation4 + $0x1], 1 }
 0x43d   :  { %676 = vsyncpa [#allocation7], 1 }
 0x43e   :  { %678 = vsyncpa [#allocation7 + $0x1], 1 }
 0x43f   :  { %679 = vsyncpa [#allocation5], 1 }
 0x440   :  { %681 = vsyncpa [#allocation5 + $0x1], 1 }

</bundles_post_ra>
